<compile_context>
chip_gen: v5e
topology: v5e:2x2
jax: 0.10.0
libtpu: 0.0.40
codegen_flags: <defaults>
</compile_context>

<pallas_src>
import jax
import jax.numpy as jnp
from jax.experimental import pallas as pl
from jax.experimental.pallas import tpu as pltpu

N_IN, N_HID, N_OUT = 10, 30, 5
GRIDLESS_MAX = 1024      # up to this batch: one block, no grid machinery
BATCH_TILE_MAX = 4096    # cap on the batch tile for the gridded path


def _fused_linear_kernel(x_ref, w_ref, b_ref, o_ref):
    # One MXU pass: (TB, 10) @ (10, 5) + (1, 5) broadcast.
    o_ref[...] = (
        jnp.dot(x_ref[...], w_ref[...], preferred_element_type=jnp.float32)
        + b_ref[...]
    ).astype(o_ref.dtype)


def fuse_params(w1, b1, w2, b2):
    """Collapse the two affine layers (exact: no activation between them)."""
    wf = w1 @ w2            # (10, 5)
    bf = b1 @ w2 + b2       # (1, 5)
    return wf, bf


def _round_up(x, m):
    return ((x + m - 1) // m) * m


def mlp_forward(x, wf, bf):
    """Forward pass of _Net using the fused parameters. Returns (B, 5)."""
    B, K = x.shape
    N = wf.shape[1]

    if B <= GRIDLESS_MAX:
        # Single-block call: 3 input DMAs + 1 output DMA around one dot.
        # (For truly tiny B this could be plain jnp, but we keep the Pallas
        # path; the launch cost only matters if this path is hot.)
        return pl.pallas_call(
            _fused_linear_kernel,
            out_shape=jax.ShapeDtypeStruct((B, N), x.dtype),
            in_specs=[
                pl.BlockSpec((B, K), lambda: (0, 0)),
                pl.BlockSpec((K, N), lambda: (0, 0)),
                pl.BlockSpec((1, N), lambda: (0, 0)),
            ],
            out_specs=pl.BlockSpec((B, N), lambda: (0, 0)),
        )(x, wf, bf)

    # Gridded path: tile over B with weights/bias VMEM-resident across steps.
    # Keep the grid length >= 4 so the "parallel" axis can shard across v7x's
    # two TensorCores and each core still double-buffers; rows per tile are a
    # multiple of 8 (sublane alignment).
    tile = min(BATCH_TILE_MAX, _round_up(pl.cdiv(B, 4), 8))
    grid = (pl.cdiv(B, tile),)
    return pl.pallas_call(
        _fused_linear_kernel,
        out_shape=jax.ShapeDtypeStruct((B, N), x.dtype),
        grid_spec=pltpu.PrefetchScalarGridSpec(
            num_scalar_prefetch=0,
            grid=grid,
            in_specs=[
                pl.BlockSpec((tile, K), lambda i: (i, 0)),
                pl.BlockSpec((K, N), lambda i: (0, 0)),   # resident weight
                pl.BlockSpec((1, N), lambda i: (0, 0)),   # resident bias
            ],
            out_specs=pl.BlockSpec((tile, N), lambda i: (i, 0)),
        ),
        compiler_params=pltpu.CompilerParams(
            dimension_semantics=("parallel",)),
    )(x, wf, bf)


def init_params(key):
    # Deterministic init mimicking torch.nn.Linear default:
    # U(-1/sqrt(fan_in), 1/sqrt(fan_in)) for both weight and bias.
    # Weights stored as (in_features, out_features) so forward is x @ W + b.
    k1, k2, k3, k4 = jax.random.split(key, 4)
    bound1 = 1.0 / jnp.sqrt(N_IN)
    bound2 = 1.0 / jnp.sqrt(N_HID)
    w1 = jax.random.uniform(k1, (N_IN, N_HID), jnp.float32, -bound1, bound1)
    b1 = jax.random.uniform(k2, (1, N_HID), jnp.float32, -bound1, bound1)
    w2 = jax.random.uniform(k3, (N_HID, N_OUT), jnp.float32, -bound2, bound2)
    b2 = jax.random.uniform(k4, (1, N_OUT), jnp.float32, -bound2, bound2)
    return w1, b1, w2, b2


if __name__ == "__main__":
    key = jax.random.PRNGKey(0)
    k_params, k_x, k_x2, k_x3 = jax.random.split(key, 4)
    w1, b1, w2, b2 = init_params(k_params)
    wf, bf = fuse_params(w1, b1, w2, b2)

    def reference(x):
        # Exact two-layer reference (PyTorch math). Layer collapse changes
        # rounding slightly; 1e-4 tolerance is ample.
        return (x @ w1 + b1) @ w2 + b2

    # --- Small-batch path (gridless single block) ---
    B = 8
    x = jax.random.normal(k_x, (B, N_IN), jnp.float32)
    out = mlp_forward(x, wf, bf)
    jax.block_until_ready(out)
    assert out.shape == (B, N_OUT)
    assert jnp.allclose(out, reference(x), atol=1e-4, rtol=1e-4)

    # --- Batched path (grid of 4 over B, resident weights, parallel axis) ---
    B2 = 2048
    x2 = jax.random.normal(k_x2, (B2, N_IN), jnp.float32)
    out2 = mlp_forward(x2, wf, bf)
    jax.block_until_ready(out2)
    assert out2.shape == (B2, N_OUT)
    assert jnp.allclose(out2, reference(x2), atol=1e-4, rtol=1e-4)

    # --- Ragged batch (B not a multiple of the tile; last block partial) ---
    B3 = 2050
    x3 = jax.random.normal(k_x3, (B3, N_IN), jnp.float32)
    out3 = mlp_forward(x3, wf, bf)
    jax.block_until_ready(out3)
    assert out3.shape == (B3, N_OUT)
    assert jnp.allclose(out3, reference(x3), atol=1e-4, rtol=1e-4)

    print("KERNEL_OK")
</pallas_src>

<mosaic_0001>
module attributes {stable_mosaic.version = 11 : i64} {
  func.func @_fused_linear_kernel(%arg0: memref<8x10xf32, #tpu.memory_space<vmem>>, %arg1: memref<10x5xf32, #tpu.memory_space<vmem>>, %arg2: memref<1x5xf32, #tpu.memory_space<vmem>>, %arg3: memref<8x5xf32, #tpu.memory_space<vmem>>) attributes {dimension_semantics = [], scalar_prefetch = 0 : i64, scratch_operands = 0 : i64, tpu.core_type = #tpu.core_type<tc>} {
    %c0 = arith.constant 0 : index
    %c0_0 = arith.constant 0 : index
    %0 = vector.load %arg0[%c0, %c0_0] : memref<8x10xf32, #tpu.memory_space<vmem>>, vector<8x10xf32>
    %c0_1 = arith.constant 0 : index
    %c0_2 = arith.constant 0 : index
    %1 = vector.load %arg1[%c0_1, %c0_2] : memref<10x5xf32, #tpu.memory_space<vmem>>, vector<10x5xf32>
    %cst = arith.constant dense<0.000000e+00> : vector<8x5xf32>
    %2 = tpu.matmul %0, %1, %cst {dimension_numbers = #tpu.dot_dimension_numbers<[1], [0], [0], [1], [0, 0, 1, 1], [], []>} : vector<8x10xf32>, vector<10x5xf32>, vector<8x5xf32> -> vector<8x5xf32>
    %c0_3 = arith.constant 0 : index
    %c0_4 = arith.constant 0 : index
    %3 = vector.load %arg2[%c0_3, %c0_4] : memref<1x5xf32, #tpu.memory_space<vmem>>, vector<1x5xf32>
    %4 = vector.broadcast %3 : vector<1x5xf32> to vector<8x5xf32>
    %5 = arith.addf %2, %4 : vector<8x5xf32>
    %c0_5 = arith.constant 0 : index
    %c0_6 = arith.constant 0 : index
    %6 = vector.load %arg3[%c0_5, %c0_6] : memref<8x5xf32, #tpu.memory_space<vmem>>, vector<8x5xf32>
    tpu.vector_store %arg3[%c0_5, %c0_6], %5 {strides = array<i32>} : memref<8x5xf32, #tpu.memory_space<vmem>>, vector<8x5xf32>,
    return
  }
}

</mosaic_0001>

<bundles_post_ra>
// kernel: tpu_custom_call.1
= control target key start
LH: loop header
LB: loop body
LE: loop exit
PB: predicated region body
PF: predicated region fallthrough
CT: control target
= control target key end

     0   :  { %vm26_vm0 = vcmask 1041408   ;;  %vm22_vm1 = vcmask 80896   ;;  %s134_s0 = inlined_call_operand.vmem [shape: f32[8,10], index: 0, kind: input, shape index: {}]   ;;  %s135_s1 = inlined_call_operand.vmem [shape: f32[10,5], index: 1, kind: input, shape index: {}]   ;;  %s136_s2 = inlined_call_operand.vmem [shape: f32[1,5], index: 2, kind: input, shape index: {}]   ;;  %s137_s3 = inlined_call_operand.hbm [shape: f32[8,5], index: 3, kind: output, shape index: {}]  }
   0x1   :  { %v17_v0 = vld [vmem:[%s135_s1 + $0x8] sm:$0x3]  ;;  %v16_v1 = vld [vmem:[%s135_s1] sm:$0xff] }
   0x2   :  { %68 = vmatpush.msk.msra.mxu0 %vm26_vm0, %v17_v0  ;;  %v15_v2 = vld [vmem:[%s134_s0] sm:$0xff] }
   0x3   :  { %8 = vsyncpa [#allocation3], 0  ;;  %v71_v3 = vld [vmem:[%s136_s2] ss:$0 sm:$0xff]  ;;  %s98_s20 = smov [#allocation2]   ;;  %s59_s24 = sshll.u32 %s137_s3, 4  ;;  %s60_s24 = int_to_ptr.hbm [resolvable:$true] %s59_s24 }
   0x4   :  { %45 = vmatpush.msra.mxu0 %v16_v1  ;;  %s57_s21 = sshll.u32 %s98_s20, 4  ;;  %vm50_vm2 = vcmask 39936   ;;  %s58_s21 = int_to_ptr.vmem [resolvable:$true] %s57_s21 }
   0x5   :  { %69 = vmatmul.msk.f32.vlgmr.msra.gmra.mxu0 %vm22_vm1, %v15_v2 }
  0x82   :  { %v47_v4 = vpop.f32.mrf.mxu0 }
  0x83   :  { %v48_v5 = vadd.f32 %v71_v3, %v47_v4 }
  0x85   :  { %51 = vst.msk [vmem:[#allocation2] sm:$0xff] %vm50_vm2, %v48_v5 }
  0x86   :  { %62 = dma.vmem_to_hbm [thread:$0]  %s58_s21, 128, %s60_s24, [#allocation3]  }
  0x87   :  { %96 = dma.done.wait [#allocation3], 128  }
  0x88   :  { %97 = vsyncadd [#allocation3], 4294967168 }
  0x89   :  { %67 = vsyncpa [#allocation3], 1 }

</bundles_post_ra>
